<compile_context>
chip_gen: v7x
topology: tpu7x:2x2x1
jax: 0.10.0
libtpu: 0.0.40
codegen_flags: <defaults>
</compile_context>

<pallas_src>
import functools

import jax
import jax.numpy as jnp
from jax import lax
from jax.experimental import pallas as pl
from jax.experimental.pallas import tpu as pltpu

LANES = 128
SUBLANES = 8


def _mae_kernel(pred_ref, true_ref, out_ref, *, rows, tile_rows,
                posinf, neginf, needs_mask):
    """Per-tile partial sums, packed into one (1, 24, 128) f32 output block.

      sublanes  0: 8 -> sum |p - t|                          (no-NaN branch)
      sublanes  8:16 -> sum |nan_to_num(p) - nan_to_num(t)|  (NaN branch)
      sublanes 16:24 -> NaN-presence indicator (> 0 iff a NaN position exists)
    """
    i = pl.program_id(0)

    def fold(x):
        # (tile_rows, 128) -> (8, 128): vreg-aligned sublane-group reduction,
        # pure elementwise VPU adds (no per-element cross-lane XLU work).
        return jnp.sum(x.reshape(tile_rows // SUBLANES, SUBLANES, LANES), axis=0)

    p = pred_ref[...].astype(jnp.float32)
    t = true_ref[...].astype(jnp.float32)

    diff = jnp.abs(p - t)
    diff_fold = fold(diff)

    # All-finite fast-path predicate: |p - t| terms are >= 0 (or NaN/Inf), so their
    # partial sums are finite iff every element of this tile is finite.  The
    # overhanging last tile (Pallas edge-pad garbage) always takes the masked path.
    take_fast = jnp.sum(diff_fold) < jnp.inf
    if needs_mask:
        take_fast = jnp.logical_and(take_fast, i != pl.num_programs(0) - 1)

    @pl.when(take_fast)
    def _fast():
        # No NaN/Inf in this tile: raw sum == nan_to_num'ed sum, NaN flag is zero.
        out_ref[0, :SUBLANES, :] = diff_fold
        out_ref[0, SUBLANES:2 * SUBLANES, :] = diff_fold
        out_ref[0, 2 * SUBLANES:, :] = jnp.zeros((SUBLANES, LANES), jnp.float32)

    @pl.when(jnp.logical_not(take_fast))
    def _slow():
        p_nan = jnp.isnan(p)
        t_nan = jnp.isnan(t)
        # torch.nan_to_num defaults: nan -> 0, +/-inf -> dtype's max/min finite value.
        p_fix = jnp.clip(jnp.where(p_nan, 0.0, p), neginf, posinf)
        t_fix = jnp.clip(jnp.where(t_nan, 0.0, t), neginf, posinf)
        # raw is only consumed globally when no NaN exists anywhere; Inf/NaN arising
        # from +/-inf inputs intentionally matches torch's raw |p - t| branch.
        raw = diff
        fix = jnp.abs(p_fix - t_fix)
        nan_any = jnp.logical_or(p_nan, t_nan)
        if needs_mask:
            # Only the overhanging last tile ever reaches this with invalid rows.
            row_ids = i * tile_rows + lax.broadcasted_iota(
                jnp.int32, (tile_rows, LANES), 0)
            valid = row_ids < rows
            raw = jnp.where(valid, raw, 0.0)
            fix = jnp.where(valid, fix, 0.0)
            nan_any = jnp.logical_and(nan_any, valid)
        out_ref[0, :SUBLANES, :] = fold(raw)
        out_ref[0, SUBLANES:2 * SUBLANES, :] = fold(fix)
        out_ref[0, 2 * SUBLANES:, :] = fold(jnp.where(nan_any, 1.0, 0.0))


def mae_loss(y_pred, y_true, *, tile_rows=None):
    """MAE loss matching MAE.forward semantics of the PyTorch module.

    torch behaviour: if ANY NaN is present in either input, BOTH inputs are
    nan_to_num'ed (nan->0, +/-inf -> dtype max/min) before mean(|p - t|); otherwise
    the raw values are used.  One fused streaming pass produces both candidate sums
    plus a NaN flag; the data-dependent select and the /N run in plain JAX.
    """
    assert y_pred.shape == y_true.shape, "y_pred and y_true must match in shape"
    n = y_pred.size
    assert n > 0, "MAE of an empty tensor is undefined"

    dtype = y_pred.dtype
    fin = (jnp.finfo(dtype) if jnp.issubdtype(dtype, jnp.floating)
           else jnp.finfo(jnp.float32))
    posinf, neginf = float(fin.max), float(fin.min)

    itemsize = jnp.dtype(dtype).itemsize
    # Sublane multiple of the minimal layout tile for this dtype: 8 (4B) / 16 (2B) / 32 (1B).
    align_rows = max(SUBLANES, 32 // itemsize)

    if tile_rows is None:
        # ~2 MiB per input block regardless of dtype (4096 rows f32 / 8192 bf16):
        # 4 MiB of HBM traffic per grid step amortizes the ~0.35 us/step overhead
        # while double-buffered inputs plus slow-path temporaries stay comfortably
        # inside scoped VMEM on every generation (including v7x's 64 MiB physical).
        tile_rows = (2 << 20) // (LANES * itemsize)

    flat_p = jnp.ravel(y_pred)     # original dtype; the f32 cast happens in-kernel
    flat_t = jnp.ravel(y_true)

    # Pad only to a lane multiple (128 elems) and only when actually needed.  Sublane
    # alignment is a BlockSpec constraint handled by the kernel's last-tile row mask,
    # so no full-array pad copy for typical (lane-aligned) shapes.
    padded = pl.cdiv(n, LANES) * LANES
    pad = padded - n
    if pad:
        flat_p = jnp.pad(flat_p, (0, pad))   # zero pads contribute nothing to any sum
        flat_t = jnp.pad(flat_t, (0, pad))
    rows = padded // LANES
    slab_p = flat_p.reshape(rows, LANES)
    slab_t = flat_t.reshape(rows, LANES)

    # Block rows: aligned to the dtype's sublane tile, capped so small inputs still
    # split into >= 2 grid steps (keeps both v7x TensorCores busy).
    tr = pl.cdiv(min(tile_rows, rows), align_rows) * align_rows
    half = pl.cdiv(pl.cdiv(rows, 2), align_rows) * align_rows
    if half < rows:
        tr = min(tr, half)
    num_tiles = pl.cdiv(rows, tr)
    needs_mask = (rows % tr) != 0

    in_block_bytes = tr * LANES * itemsize
    vmem_limit = int(min(64 << 20, max(48 << 20, 12 * in_block_bytes)))

    kernel = functools.partial(
        _mae_kernel, rows=rows, tile_rows=tr,
        posinf=posinf, neginf=neginf, needs_mask=needs_mask)

    out_rows = 3 * SUBLANES
    parts = pl.pallas_call(
        kernel,
        out_shape=jax.ShapeDtypeStruct((num_tiles, out_rows, LANES), jnp.float32),
        grid_spec=pltpu.PrefetchScalarGridSpec(
            num_scalar_prefetch=0,
            grid=(num_tiles,),
            in_specs=[
                pl.BlockSpec((tr, LANES), lambda i: (i, 0)),
                pl.BlockSpec((tr, LANES), lambda i: (i, 0)),
            ],
            # Single packed output block per step -> one output DMA instead of three.
            out_specs=pl.BlockSpec((1, out_rows, LANES), lambda i: (i, 0, 0)),
        ),
        compiler_params=pltpu.CompilerParams(
            # Each step owns its own output tile (no carried accumulator), so the
            # reduction grid can be split across both TensorCores on v7x.
            dimension_semantics=("parallel",),
            vmem_limit_bytes=vmem_limit,
        ),
    )(slab_p, slab_t)

    sum_raw = jnp.sum(parts[:, :SUBLANES, :])
    sum_fix = jnp.sum(parts[:, SUBLANES:2 * SUBLANES, :])
    has_nan = jnp.sum(parts[:, 2 * SUBLANES:, :]) > 0.0
    # TODO(synk): the host-side "WARNING: NaN values detected" print of the PyTorch
    #             module is a host I/O side-effect and is not reproduced.
    return jnp.where(has_nan, sum_fix, sum_raw) / jnp.float32(n)


def _reference_mae(y_pred, y_true):
    """Pure-JAX replica of the PyTorch module's forward (for testing)."""
    has_nan = jnp.any(jnp.isnan(y_pred)) | jnp.any(jnp.isnan(y_true))
    fixed = jnp.mean(jnp.abs(jnp.nan_to_num(y_pred) - jnp.nan_to_num(y_true)))
    raw = jnp.mean(jnp.abs(y_pred - y_true))
    return jnp.where(has_nan, fixed, raw)


if __name__ == "__main__":
    key = jax.random.PRNGKey(0)
    k1, k2 = jax.random.split(key)
    x_shape = (2, 4, 16, 16)  # NCHW-style example inputs
    y_pred = jax.random.normal(k1, x_shape, dtype=jnp.float32)
    y_true = jax.random.normal(k2, x_shape, dtype=jnp.float32)

    # Clean-input path (no NaN -> raw |p - t| branch, all-fast-path tiles).
    loss = jax.block_until_ready(mae_loss(y_pred, y_true))
    ref = _reference_mae(y_pred, y_true)
    assert jnp.allclose(loss, ref, rtol=1e-5, atol=1e-6), (loss, ref)

    # NaN path (torch.nan_to_num branch; one tile falls through to the slow path).
    y_nan = y_pred.at[0, 1, 2, 3].set(jnp.nan)
    loss_nan = jax.block_until_ready(mae_loss(y_nan, y_true))
    ref_nan = _reference_mae(y_nan, y_true)
    assert jnp.allclose(loss_nan, ref_nan, rtol=1e-5, atol=1e-6), (loss_nan, ref_nan)

    # Ragged tile / gated last-tile mask path (rows not a multiple of tile_rows).
    k3, k4 = jax.random.split(k2)
    a = jax.random.normal(k3, (3, 1024), dtype=jnp.float32)
    b = jax.random.normal(k4, (3, 1024), dtype=jnp.float32)
    loss_r = jax.block_until_ready(mae_loss(a, b, tile_rows=16))
    ref_r = _reference_mae(a, b)
    assert jnp.allclose(loss_r, ref_r, rtol=1e-5, atol=1e-6), (loss_r, ref_r)

    # Lane-unaligned element count (wrapper 128-pad) plus a NaN -> masked slow path.
    k5, k6 = jax.random.split(k4)
    c = jax.random.normal(k5, (5, 100), dtype=jnp.float32)
    d = jax.random.normal(k6, (5, 100), dtype=jnp.float32)
    c_nan = c.at[4, 99].set(jnp.nan)
    loss_u = jax.block_until_ready(mae_loss(c_nan, d))
    ref_u = _reference_mae(c_nan, d)
    assert jnp.allclose(loss_u, ref_u, rtol=1e-5, atol=1e-6), (loss_u, ref_u)

    print("KERNEL_OK")
</pallas_src>

<mosaic_0001>
module attributes {stable_mosaic.version = 11 : i64} {
  func.func @_mae_kernel(%arg0: i32, %arg1: memref<8x128xf32, #tpu.memory_space<vmem>>, %arg2: memref<8x128xf32, #tpu.memory_space<vmem>>, %arg3: memref<1x24x128xf32, #tpu.memory_space<vmem>>) attributes {dimension_semantics = [#tpu.dimension_semantics<parallel>], iteration_bounds = array<i64: 2>, scalar_prefetch = 0 : i64, scratch_operands = 0 : i64, tpu.core_type = #tpu.core_type<tc>, window_params = [{transform_indices = @transform_0, window_bounds = array<i64: 8, 128>}, {transform_indices = @transform_1, window_bounds = array<i64: 8, 128>}, {transform_indices = @transform_2, window_bounds = array<i64: 1, 24, 128>}]} {
    %c0 = arith.constant 0 : index
    %c0_0 = arith.constant 0 : index
    %0 = vector.load %arg1[%c0, %c0_0] : memref<8x128xf32, #tpu.memory_space<vmem>>, vector<8x128xf32>
    %c0_1 = arith.constant 0 : index
    %c0_2 = arith.constant 0 : index
    %1 = vector.load %arg2[%c0_1, %c0_2] : memref<8x128xf32, #tpu.memory_space<vmem>>, vector<8x128xf32>
    %2 = arith.subf %0, %1 : vector<8x128xf32>
    %3 = math.absf %2 : vector<8x128xf32>
    %4 = vector.shape_cast %3 : vector<8x128xf32> to vector<1x8x128xf32>
    %cst = arith.constant dense<0.000000e+00> : vector<8x128xf32>
    %5 = vector.multi_reduction <add>, %4, %cst [0] : vector<1x8x128xf32> to vector<8x128xf32>
    %6 = vector.shape_cast %5 : vector<8x128xf32> to vector<1x8x128xf32>
    %cst_3 = arith.constant dense<0.000000e+00> : vector<1xf32>
    %7 = vector.multi_reduction <add>, %6, %cst_3 [1, 2] : vector<1x8x128xf32> to vector<1xf32>
    %8 = vector.shape_cast %7 : vector<1xf32> to vector<1x1x1xf32>
    %9 = vector.extract %8[0, 0, 0] : f32 from vector<1x1x1xf32>
    %cst_4 = arith.constant 0x7F800000 : f32
    %10 = arith.cmpf olt, %9, %cst_4 : f32
    %11 = arith.extui %10 : i1 to i32
    %c0_i32 = arith.constant 0 : i32
    %12 = arith.cmpi ne, %11, %c0_i32 : i32
    scf.if %12 {
      %c0_6 = arith.constant 0 : index
      %c0_7 = arith.constant 0 : index
      %c0_8 = arith.constant 0 : index
      %16 = vector.load %arg3[%c0_6, %c0_7, %c0_8] : memref<1x24x128xf32, #tpu.memory_space<vmem>>, vector<1x8x128xf32>
      %17 = vector.shape_cast %16 : vector<1x8x128xf32> to vector<8x128xf32>
      %18 = vector.shape_cast %5 : vector<8x128xf32> to vector<1x8x128xf32>
      tpu.vector_store %arg3[%c0_6, %c0_7, %c0_8], %18 {strides = array<i32>} : memref<1x24x128xf32, #tpu.memory_space<vmem>>, vector<1x8x128xf32>,
      %c0_9 = arith.constant 0 : index
      %c8 = arith.constant 8 : index
      %c0_10 = arith.constant 0 : index
      %19 = vector.load %arg3[%c0_9, %c8, %c0_10] : memref<1x24x128xf32, #tpu.memory_space<vmem>>, vector<1x8x128xf32>
      %20 = vector.shape_cast %19 : vector<1x8x128xf32> to vector<8x128xf32>
      %21 = vector.shape_cast %5 : vector<8x128xf32> to vector<1x8x128xf32>
      tpu.vector_store %arg3[%c0_9, %c8, %c0_10], %21 {strides = array<i32>} : memref<1x24x128xf32, #tpu.memory_space<vmem>>, vector<1x8x128xf32>,
      %cst_11 = arith.constant 0.000000e+00 : f32
      %22 = vector.broadcast %cst_11 : f32 to vector<8x128xf32>
      %c0_12 = arith.constant 0 : index
      %c16 = arith.constant 16 : index
      %c0_13 = arith.constant 0 : index
      %23 = vector.load %arg3[%c0_12, %c16, %c0_13] : memref<1x24x128xf32, #tpu.memory_space<vmem>>, vector<1x8x128xf32>
      %24 = vector.shape_cast %23 : vector<1x8x128xf32> to vector<8x128xf32>
      %25 = vector.shape_cast %22 : vector<8x128xf32> to vector<1x8x128xf32>
      tpu.vector_store %arg3[%c0_12, %c16, %c0_13], %25 {strides = array<i32>} : memref<1x24x128xf32, #tpu.memory_space<vmem>>, vector<1x8x128xf32>,
    } else {
    }
    %true = arith.constant true
    %13 = arith.xori %10, %true : i1
    %14 = arith.extui %13 : i1 to i32
    %c0_i32_5 = arith.constant 0 : i32
    %15 = arith.cmpi ne, %14, %c0_i32_5 : i32
    scf.if %15 {
      %16 = arith.cmpf one, %0, %0 : vector<8x128xf32>
      %17 = arith.cmpf one, %1, %1 : vector<8x128xf32>
      %cst_6 = arith.constant 0.000000e+00 : f32
      %18 = vector.broadcast %cst_6 : f32 to vector<8x128xf32>
      %19 = arith.select %16, %18, %0 : vector<8x128xi1>, vector<8x128xf32>
      %cst_7 = arith.constant -3.40282347E+38 : f32
      %cst_8 = arith.constant 3.40282347E+38 : f32
      %20 = vector.broadcast %cst_7 : f32 to vector<8x128xf32>
      %21 = arith.maximumf %20, %19 : vector<8x128xf32>
      %22 = vector.broadcast %cst_8 : f32 to vector<8x128xf32>
      %23 = arith.minimumf %22, %21 : vector<8x128xf32>
      %cst_9 = arith.constant 0.000000e+00 : f32
      %24 = vector.broadcast %cst_9 : f32 to vector<8x128xf32>
      %25 = arith.select %17, %24, %1 : vector<8x128xi1>, vector<8x128xf32>
      %cst_10 = arith.constant -3.40282347E+38 : f32
      %cst_11 = arith.constant 3.40282347E+38 : f32
      %26 = vector.broadcast %cst_10 : f32 to vector<8x128xf32>
      %27 = arith.maximumf %26, %25 : vector<8x128xf32>
      %28 = vector.broadcast %cst_11 : f32 to vector<8x128xf32>
      %29 = arith.minimumf %28, %27 : vector<8x128xf32>
      %30 = arith.subf %23, %29 : vector<8x128xf32>
      %31 = math.absf %30 : vector<8x128xf32>
      %32 = arith.ori %16, %17 : vector<8x128xi1>
      %33 = vector.shape_cast %3 : vector<8x128xf32> to vector<1x8x128xf32>
      %cst_12 = arith.constant dense<0.000000e+00> : vector<8x128xf32>
      %34 = vector.multi_reduction <add>, %33, %cst_12 [0] : vector<1x8x128xf32> to vector<8x128xf32>
      %c0_13 = arith.constant 0 : index
      %c0_14 = arith.constant 0 : index
      %c0_15 = arith.constant 0 : index
      %35 = vector.load %arg3[%c0_13, %c0_14, %c0_15] : memref<1x24x128xf32, #tpu.memory_space<vmem>>, vector<1x8x128xf32>
      %36 = vector.shape_cast %35 : vector<1x8x128xf32> to vector<8x128xf32>
      %37 = vector.shape_cast %34 : vector<8x128xf32> to vector<1x8x128xf32>
      tpu.vector_store %arg3[%c0_13, %c0_14, %c0_15], %37 {strides = array<i32>} : memref<1x24x128xf32, #tpu.memory_space<vmem>>, vector<1x8x128xf32>,
      %38 = vector.shape_cast %31 : vector<8x128xf32> to vector<1x8x128xf32>
      %cst_16 = arith.constant dense<0.000000e+00> : vector<8x128xf32>
      %39 = vector.multi_reduction <add>, %38, %cst_16 [0] : vector<1x8x128xf32> to vector<8x128xf32>
      %c0_17 = arith.constant 0 : index
      %c8 = arith.constant 8 : index
      %c0_18 = arith.constant 0 : index
      %40 = vector.load %arg3[%c0_17, %c8, %c0_18] : memref<1x24x128xf32, #tpu.memory_space<vmem>>, vector<1x8x128xf32>
      %41 = vector.shape_cast %40 : vector<1x8x128xf32> to vector<8x128xf32>
      %42 = vector.shape_cast %39 : vector<8x128xf32> to vector<1x8x128xf32>
      tpu.vector_store %arg3[%c0_17, %c8, %c0_18], %42 {strides = array<i32>} : memref<1x24x128xf32, #tpu.memory_space<vmem>>, vector<1x8x128xf32>,
      %cst_19 = arith.constant 1.000000e+00 : f32
      %cst_20 = arith.constant 0.000000e+00 : f32
      %43 = vector.broadcast %cst_19 : f32 to vector<8x128xf32>
      %44 = vector.broadcast %cst_20 : f32 to vector<8x128xf32>
      %45 = arith.select %32, %43, %44 : vector<8x128xi1>, vector<8x128xf32>
      %46 = vector.shape_cast %45 : vector<8x128xf32> to vector<1x8x128xf32>
      %cst_21 = arith.constant dense<0.000000e+00> : vector<8x128xf32>
      %47 = vector.multi_reduction <add>, %46, %cst_21 [0] : vector<1x8x128xf32> to vector<8x128xf32>
      %c0_22 = arith.constant 0 : index
      %c16 = arith.constant 16 : index
      %c0_23 = arith.constant 0 : index
      %48 = vector.load %arg3[%c0_22, %c16, %c0_23] : memref<1x24x128xf32, #tpu.memory_space<vmem>>, vector<1x8x128xf32>
      %49 = vector.shape_cast %48 : vector<1x8x128xf32> to vector<8x128xf32>
      %50 = vector.shape_cast %47 : vector<8x128xf32> to vector<1x8x128xf32>
      tpu.vector_store %arg3[%c0_22, %c16, %c0_23], %50 {strides = array<i32>} : memref<1x24x128xf32, #tpu.memory_space<vmem>>, vector<1x8x128xf32>,
    } else {
    }
    return
  }
  func.func @transform_0(%arg0: i32) -> (i32, i32) {
    %c0_i32 = arith.constant 0 : i32
    %c0_i32_0 = arith.constant 0 : i32
    return %arg0, %c0_i32 : i32, i32
  }
  func.func @transform_1(%arg0: i32) -> (i32, i32) {
    %c0_i32 = arith.constant 0 : i32
    %c0_i32_0 = arith.constant 0 : i32
    return %arg0, %c0_i32 : i32, i32
  }
  func.func @transform_2(%arg0: i32) -> (i32, i32, i32) {
    %c0_i32 = arith.constant 0 : i32
    %c0_i32_0 = arith.constant 0 : i32
    %c0_i32_1 = arith.constant 0 : i32
    return %arg0, %c0_i32, %c0_i32_0 : i32, i32, i32
  }
}

</mosaic_0001>

<bundles_post_ra>
// kernel: tpu_custom_call.1
= control target key start
LH: loop header
LB: loop body
LE: loop exit
PB: predicated region body
PF: predicated region fallthrough
CT: control target
= control target key end

     0   :  { %7 = vsyncpa [#allocation3], 0  ;;  %s787_s0 = inlined_call_operand.hbm [shape: f32[16,128], index: 0, kind: input, shape index: {}]   ;;  %s788_s1 = inlined_call_operand.hbm [shape: f32[16,128], index: 1, kind: input, shape index: {}]   ;;  %s789_s2 = inlined_call_operand.hbm [shape: f32[2,24,128], index: 2, kind: output, shape index: {}]  }
   0x1   :  { %9 = vsyncpa [#allocation3 + $0x1], 0 }
   0x2   :  { %10 = vsyncpa [#allocation6], 0 }
   0x3   :  { %12 = vsyncpa [#allocation6 + $0x1], 0 }
   0x4   :  { %13 = vsyncpa [#allocation4], 0 }
   0x5   :  { %15 = vsyncpa [#allocation4 + $0x1], 0  ;;  %s575_s9 = smov 0   ;;  %s577_s10 = smov 0  }
   0x6   :  { %s579_s11 = smov 0   ;;  %s581_s12 = smov 0  }
   0x7 LB: > { %s596_s13 = sadd.s32 4294967295, %s551_s12   ;;  %s347_s14 = sadd.s32 4294967294, %s551_s12   ;;  %s551_s12 = sphi %s581_s12, %s808_s12   ;;  %s547_s11 = sphi %s579_s11, %s807_s11   ;;  %s543_s10 = sphi %s577_s10, %s806_s10   ;;  %s539_s9 = sphi %s575_s9, %s805_s9  }
   0x8   : > { %s600_s15 = sadd.s32 1, %s551_s12   ;;  %s28_s16 = sadd.s32 1, %s547_s11 }
   0x9   : > { %s25_s17 = ssub.s32 %s551_s12, %s600_s15  ;;  %p35_p0 = scmp.ne.s32.totalorder %s547_s11, %s543_s10 }
   0xa   : > { %p26_p1 = scmp.eq.s32.totalorder %s25_s17, 0  ;;  %p36_p2 = scmp.eq.s32.totalorder %s551_s12, 0 }
   0xb   : > { %p41_p3 = scmp.ne.s32.totalorder %s543_s10, %s539_s9  ;;  %p42_p4 = scmp.eq.s32.totalorder %s596_s13, 0 }
   0xc   : > { %s612_s18 = scalar_select %p26_p1, %s547_s11, %s28_s16  }
   0xd   : > { %p614_p5 = por %p36_p2, %p35_p0  ;;  %p618_p6 = por %p42_p4, %p41_p3 }
   0xe   : > { %p91_p7 = scmp.eq.s32.totalorder %s596_s13, 1  ;;  %p97_p8 = scmp.eq.s32.totalorder %s347_s14, 1 }
   0xf   : > { %s793_s20 = scalar_select %p618_p6, 1, 0 }
  0x10   : > { %p383_p10 = scmp.lt.s32.totalorder %s551_s12, 2  ;;  %p625_p11 = por %p91_p7, %p35_p0 }
  0x11   : > { %p629_p12 = por %p97_p8, %p41_p3  ;;  %s634_s23 = sand.u32 1, %s547_s11  }
  0x12   : > { %s794_s21 = scalar_select %p625_p11, 1, 0 }
  0x13   : > { %s795_s22 = scalar_select %p629_p12, 1, 0 }
  0x14   : > { %s351_s24 = sshll.u32 %s551_s12, 7  ;;  %s350_s25 = sshll.u32 %s634_s23, 3 }
  0x15   : > { %s643_s28 = scalar_lea.hbm %s787_s0, %s351_s24  ;;  %s121_s29 = scalar_lea.vmem [#allocation2], %s350_s25 }
  0x16   : > { %s128_s30 = sshll.u32 %s121_s29, 4  ;;  %p649_p13 = pnand %p383_p10, %p614_p5  ;;  %s653_s30 = int_to_ptr.vmem [resolvable:$true] %s128_s30 }
  0x17   : > { %s118_s4 = scalar_lea.sflag [#allocation3], %s634_s23  ;;  %s421_s5 = scalar_lea.hbm %s643_s28, 128 }
  0x18   : > { %p422_p2 = scmp.ne.s32.totalorder %s643_s28, %s421_s5  ;;  %p423_p3 = pneg %p649_p13 }
  0x19   : > { %s426_s8 = scalar_lea.hbm %s787_s0, 256  ;;  %p427_p5 = scmp.lt.u32.totalorder %s643_s28, %s787_s0 }
  0x1a   : > { %p424_p4 = pnand %p423_p3, %p422_p2  ;;  %p428_p8 = scmp.lt.u32.totalorder %s426_s8, %s421_s5 }
  0x1b   : > { %p430_p9 = scmp.lt.u32.totalorder %s421_s5, %s643_s28 }
  0x1c   : > { %p425_p7 = pneg %p424_p4  ;;  %p429_p10 = por %p428_p8, %p427_p5 }
  0x1e   : > { %p431_p0 = por %p430_p9, %p429_p10 }
  0x20   : > { %p432_p1 = pnand %p431_p0, %p425_p7 }
  0x22   : > { %435 = shalt.err (!%p432_p1)
}
  0x23   : > { %s436_s17 = scalar_lea.vmem %s653_s30, 128  ;;  %s553_s19 = smov [#allocation2]  }
  0x24   : > { %p437_p2 = scmp.ne.s32.totalorder %s653_s30, %s436_s17  ;;  %s441_s26 = sshll.u32 %s553_s19, 4  ;;  %s442_s26 = int_to_ptr.vmem [resolvable:$false] %s441_s26 }
  0x25   : > { %s443_s27 = scalar_lea.vmem %s442_s26, 256  ;;  %p444_p11 = scmp.lt.s32.totalorder %s653_s30, %s442_s26 }
  0x26   : > { %p439_p4 = pnand %p437_p2, %p423_p3  ;;  %p445_p5 = scmp.lt.s32.totalorder %s443_s27, %s436_s17 }
  0x28   : > { %p440_p12 = pneg %p439_p4  ;;  %p446_p8 = por %p445_p5, %p444_p11 }
  0x2a   : > { %p447_p9 = pnand %p446_p8, %p440_p12 }
  0x2c   : > { %450 = shalt.err (!%p447_p9)
}
  0x2d   : > { %375 = dma.hbm_to_vmem [thread:$0]  (!%p649_p13), %s643_s28, 128, %s653_s30, %s118_s4  }
  0x2e   : > { %p797_p0 = scmp.lt.s32.totalorder %s551_s12, 3  ;;  %p798_p1 = scmp.ge.s32.totalorder %s551_s12, 1 }
  0x2f   : > { %s696_s7 = scalar_lea.hbm %s788_s1, %s351_s24  ;;  %s139_s8 = scalar_lea.vmem [#allocation5], %s350_s25 }
  0x30   : > { %p687_p7 = pnand %p798_p1, %p797_p0  ;;  %s146_s14 = sshll.u32 %s139_s8, 4  ;;  %s147_s14 = int_to_ptr.vmem [resolvable:$true] %s146_s14 }
  0x31   : > { %s136_s28 = scalar_lea.sflag [#allocation6], %s634_s23  ;;  %s451_s30 = scalar_lea.hbm %s696_s7, 128 }
  0x32   : > { %s799_s29 = scalar_select %p687_p7, 1, 0 }
  0x33   : > { %p452_p11 = scmp.ne.s32.totalorder %s696_s7, %s451_s30  ;;  %s456_s24 = scalar_lea.hbm %s788_s1, 256 }
  0x34   : > { %p457_p2 = scmp.lt.u32.totalorder %s696_s7, %s788_s1  ;;  %p458_p4 = scmp.lt.u32.totalorder %s456_s24, %s451_s30 }
  0x35   : > { %p454_p12 = pnand %p452_p11, %p423_p3  ;;  %p460_p8 = scmp.lt.u32.totalorder %s451_s30, %s696_s7 }
  0x36   : > { %p459_p5 = por %p458_p4, %p457_p2 }
  0x37   : > { %p455_p10 = pneg %p454_p12 }
  0x38   : > { %p461_p9 = por %p460_p8, %p459_p5 }
  0x3a   : > { %p462_p0 = pnand %p461_p9, %p455_p10 }
  0x3c   : > { %465 = shalt.err (!%p462_p0)
}
  0x3d   : > { %s466_s23 = scalar_lea.vmem %s147_s14, 128  ;;  %s554_s25 = smov [#allocation5]  }
  0x3e   : > { %p467_p1 = scmp.ne.s32.totalorder %s147_s14, %s466_s23  ;;  %s471_s26 = sshll.u32 %s554_s25, 4  ;;  %s472_s26 = int_to_ptr.vmem [resolvable:$false] %s471_s26 }
  0x3f   : > { %s473_s27 = scalar_lea.vmem %s472_s26, 256  ;;  %p474_p6 = scmp.lt.s32.totalorder %s147_s14, %s472_s26 }
  0x40   : > { %p469_p11 = pnand %p467_p1, %p423_p3  ;;  %p475_p7 = scmp.lt.s32.totalorder %s473_s27, %s466_s23 }
  0x42   : > { %p470_p12 = pneg %p469_p11  ;;  %p476_p2 = por %p475_p7, %p474_p6 }
  0x44   : > { %p477_p4 = pnand %p476_p2, %p470_p12 }
  0x46   : > { %480 = shalt.err (!%p477_p4)
}
  0x47   : > { %378 = dma.hbm_to_vmem [thread:$0]  (!%p649_p13), %s696_s7, 128, %s147_s14, %s136_s28  }
  0x48   : > { %p800_p10 = scmp.ne.s32.totalorder %s799_s29, 0 }
  0x49   : > { %s723_s5 = sand.u32 (!%p800_p10), 1, %s543_s10   ;;  %p801_p3 = scmp.ne.s32.totalorder (!%p800_p10), %s793_s20, 0 }
  0x4a   : > { %155 = sbr.rel (%p800_p10) target bundleno = 337 (0x151), region = 28  ;;  %s355_s6 = sshll.u32 (!%p800_p10), %s723_s5, 3 }
  0x4b   : > { %s158_s8 = scalar_lea.sflag (!%p800_p10), [#allocation3], %s723_s5  ;;  %s161_s30 = scalar_lea.vmem (!%p800_p10), [#allocation2], %s355_s6 }
  0x51   : > { %526 = dma.done.wait (%p801_p3), %s158_s8, 128  }
  0x52   : > { %528 = vsyncadd (%p801_p3), %s158_s8, 4294967168  ;;  %s167_s3 = scalar_lea.sflag [#allocation6], %s723_s5  ;;  %s170_s7 = scalar_lea.vmem [#allocation5], %s355_s6 }
  0x53   : > { %530 = dma.done.wait (%p801_p3), %s167_s3, 128  }
  0x54   : > { %532 = vsyncadd (%p801_p3), %s167_s3, 4294967168  ;;  %s362_s29 = smul.u32 24, %s723_s5  ;;  %v196_v0 = vld [vmem:[%s161_s30] sm:$0xff]  ;;  %v197_v1 = vld [vmem:[%s170_s7] sm:$0xff] }
  0x55   : > { %v198_v2 = vsub.f32 %v196_v0, %v197_v1 }
  0x56   : > { %s195_s28 = scalar_lea.vmem [#allocation7], %s362_s29 }
  0x57   : > { %v199_v3 = vand.u32 2147483647, %v198_v2 }
  0x59   : > { %201 = vadd.xlane.f32.xlu0 %v199_v3 }
  0xe6   : > { %v202_v4 = vpop.xlane.xlu0 %201 }
  0xe7   : > { %v203_v5 = vrot.slane %v202_v4, 4 }
  0xe9   : > { %v204_v6 = vadd.f32 %v203_v5, %v202_v4 }
  0xeb   : > { %v205_v7 = vrot.slane %v204_v6, 2 }
  0xed   : > { %v206_v8 = vadd.f32 %v205_v7, %v204_v6 }
  0xef   : > { %v207_v9 = vrot.slane %v206_v8, 1 }
  0xf1   : > { %v208_v10 = vadd.f32 %v207_v9, %v206_v8 }
  0xf3   : > { %363 = vpush %v208_v10 }
 0x124   : > { %s364_s14 = spop %363 }
 0x125   : > { %p210_p6 = scmp.lt.f32.partialorder %s364_s14, inf }
 0x126   : > { %214 = vst [vmem:[%s195_s28] sm:$0xff] (%p210_p6), %v199_v3  ;;  %215 = vst [vmem:[%s195_s28 + $0x8] sm:$0xff] (%p210_p6), %v199_v3  ;;  %v555_v11 = vmov (%p210_p6), 0.0  }
 0x127   : > { %213 = sbr.rel (!%p210_p6) target bundleno = 302 (0x12e), region = 40  ;;  %216 = vst [vmem:[%s195_s28 + $0x10] sm:$0xff] (%p210_p6), %v555_v11 }
 0x12e PF: > { %219 = sbr.rel (%p210_p6) target bundleno = 311 (0x137), region = 44  ;;  %231 = vst [vmem:[%s195_s28] sm:$0xff] (!%p210_p6), %v199_v3  ;;  %vm220_vm0 = vcmp.ne.f32.partialorder (!%p210_p6), %v196_v0, %v196_v0  ;;  %vm221_vm1 = vcmp.ne.f32.partialorder (!%p210_p6), %v197_v1, %v197_v1  ;;  %v556_v16 = vmov (!%p210_p6), 0.0  }
 0x12f   : > { %v222_v12 = vsel (!%p210_p6), %vm220_vm0, 0.0, %v196_v0  ;;  %v225_v13 = vsel (!%p210_p6), %vm221_vm1, 0.0, %v197_v1  ;;  %vm230_vm2 = vmor (!%p210_p6), %vm220_vm0, %vm221_vm1 }
 0x130   : > { %v357_v14 = vclamps-f32 (!%p210_p6), %v222_v12, 3.4028235e+38  ;;  %v358_v15 = vclamps-f32 (!%p210_p6), %v225_v13, 3.4028235e+38  ;;  %v234_v17 = vsel (!%p210_p6), %vm230_vm2, 1.0, %v556_v16 }
 0x131   : > { %236 = vst [vmem:[%s195_s28 + $0x10] sm:$0xff] (!%p210_p6), %v234_v17 }
 0x132   : > { %v228_v18 = vsub.f32 (!%p210_p6), %v357_v14, %v358_v15 }
 0x134   : > { %v229_v19 = vand.u32 (!%p210_p6), 2147483647, %v228_v18 }
 0x136   : > { %233 = vst [vmem:[%s195_s28 + $0x8] sm:$0xff] %v229_v19 }
 0x137 PF: > { %s365_s20 = smul.u32 384, %s596_s13  ;;  %s251_s4 = sshll.u32 %s195_s28, 4  ;;  %s743_s4 = int_to_ptr.vmem [resolvable:$true] %s251_s4 }
 0x138   : > { %s238_s19 = scalar_lea.sflag [#allocation4], %s723_s5  ;;  %s481_s23 = scalar_lea.vmem %s743_s4, 384 }
 0x139   : > { %s741_s17 = scalar_lea.hbm %s789_s2, %s365_s20  ;;  %p482_p13 = scmp.ne.s32.totalorder %s743_s4, %s481_s23 }
 0x13a   : > { %p802_p7 = scmp.ne.s32.totalorder %s794_s21, 0  ;;  %s557_s25 = smov [#allocation7]  }
 0x13b   : > { %s485_s26 = sshll.u32 %s557_s25, 4  ;;  %s486_s26 = int_to_ptr.vmem [resolvable:$false] %s485_s26 }
 0x13c   : > { %p483_p5 = pnand %p482_p13, %p802_p7  ;;  %s487_s13 = scalar_lea.vmem %s486_s26, 768 }
 0x13d   : > { %p488_p9 = scmp.lt.s32.totalorder %s743_s4, %s486_s26  ;;  %p489_p0 = scmp.lt.s32.totalorder %s487_s13, %s481_s23 }
 0x13e   : > { %p484_p8 = pneg %p483_p5 }
 0x13f   : > { %p490_p1 = por %p489_p0, %p488_p9 }
 0x141   : > { %p491_p11 = pnand %p490_p1, %p484_p8 }
 0x143   : > { %494 = shalt.err (!%p491_p11)
}
 0x144   : > { %s495_s27 = scalar_lea.hbm %s741_s17, 384  ;;  %s499_s30 = scalar_lea.hbm %s789_s2, 768 }
 0x145   : > { %p496_p12 = scmp.ne.s32.totalorder %s741_s17, %s495_s27  ;;  %p500_p10 = scmp.lt.u32.totalorder %s741_s17, %s789_s2 }
 0x146   : > { %p501_p3 = scmp.lt.u32.totalorder %s499_s30, %s495_s27  ;;  %p503_p13 = scmp.lt.u32.totalorder %s495_s27, %s741_s17 }
 0x147   : > { %p497_p2 = pnand %p496_p12, %p802_p7 }
 0x148   : > { %p502_p6 = por %p501_p3, %p500_p10 }
 0x149   : > { %p498_p4 = pneg %p497_p2 }
 0x14a   : > { %p504_p5 = por %p503_p13, %p502_p6 }
 0x14c   : > { %p505_p8 = pnand %p504_p5, %p498_p4 }
 0x14e   : > { %508 = shalt.err (!%p505_p8)
}
 0x14f   : > { %s558_s29 = smov 128   ;;  %s559_s14 = smov 8  }
 0x150   : > { %370 = dma.vmem_to_hbm [thread:$0]  (%p802_p7), %s743_s4, 384, %s741_s17, %s238_s19, %s558_s29, %s558_s29, %s559_s14  }
 0x151 PF: > { %s266_s28 = sand.u32 1, %s539_s9   ;;  %p803_p9 = scmp.ne.s32.totalorder %s795_s22, 0 }
 0x152   : > { %p804_p0 = scmp.ge.s32.totalorder %s551_s12, 2  ;;  %s267_s20 = scalar_lea.sflag [#allocation4], %s266_s28 }
 0x154   : > { %p380_p1 = pnand %p804_p0, %p803_p9 }
 0x156   : > { %534 = dma.done.wait (!%p380_p1), %s267_s20, 384  }
 0x157   : > { %536 = vsyncadd (!%p380_p1), %s267_s20, 4294966912  ;;  %p18_p11 = scmp.ge.s32.totalorder %s600_s15, 4   ;;  %s805_s9 = smov %s543_s10 }
 0x158   : > { %s806_s10 = smov %s547_s11  ;;  %s807_s11 = smov %s612_s18 }
 0x159   : > { %s808_s12 = smov %s600_s15  ;;  %20 = sbr.rel (!%p18_p11) target bundleno = 7 (0x7), region = 94 }
 0x160   :  { %272 = vsyncpa [#allocation3], 1 }
 0x161   :  { %274 = vsyncpa [#allocation3 + $0x1], 1 }
 0x162   :  { %275 = vsyncpa [#allocation6], 1 }
 0x163   :  { %277 = vsyncpa [#allocation6 + $0x1], 1 }
 0x164   :  { %278 = vsyncpa [#allocation4], 1 }
 0x165   :  { %280 = vsyncpa [#allocation4 + $0x1], 1 }

</bundles_post_ra>
